<compile_context>
chip_gen: v5e
topology: v5e:2x2
jax: 0.10.0
libtpu: 0.0.40
codegen_flags: <defaults>
</compile_context>

<pallas_src>
import functools

import jax
import jax.numpy as jnp
from jax.experimental import pallas as pl
from jax.experimental.pallas import tpu as pltpu


def _round_up(x, m):
    return ((x + m - 1) // m) * m


def _stop_predictor_kernel(x_ref, w1_ref, b1_ref, w2_ref, b2_ref, o_ref):
    # x_ref:  (TB, C)  VMEM      w1_ref: (C, H) VMEM     b1_ref: (1, H) VMEM
    # w2_ref: (1, H)   VMEM      b2_ref: (1,)   SMEM     o_ref:  (1, TB) VMEM
    tb = x_ref.shape[0]

    x = x_ref[...]
    # Hidden layer on the MXU, fp32 accumulate.
    h = jnp.dot(x, w1_ref[...], preferred_element_type=jnp.float32) + b1_ref[...]
    # LeakyReLU (PyTorch default negative_slope = 0.01).
    h = jnp.where(h > 0, h, 0.01 * h)

    # Output layer: (H -> 1) as VPU multiply + lane reduction (avoids a 2nd MXU round-trip),
    # plus the scalar bias read from SMEM.
    z = jnp.sum(h * w2_ref[...], axis=-1) + b2_ref[0]            # (TB,)

    # Sigmoid: exp on the EUP, approximate reciprocal also on the EUP (free slot).
    # Note: for very negative z, exp(-z) -> inf and the result correctly rounds to 0.
    s = pl.reciprocal(1.0 + jnp.exp(-z), approx=True)            # (TB,)

    # Lane-dense store: batch on the lane axis.
    o_ref[...] = s.reshape(1, tb).astype(o_ref.dtype)


@functools.partial(jax.jit, static_argnames=("block_b",))
def stop_predictor_pallas(context, w1, b1, w2, b2, *, block_b=1024):
    """StopPredictor forward.

    context: (B, C) float32
    w1: (C, H), b1: (H,) — first Linear stored transposed vs. PyTorch (in, out)
    w2: (H, 1), b2: (1,) — second Linear stored transposed vs. PyTorch
    Returns (B,) float32 — matches x.squeeze(-1).
    """
    B, C = context.shape
    H = w1.shape[1]

    # Batch tile: multiple of 128 so the (1, TB) output block is lane-dense even when
    # the grid has multiple steps; cap at block_b to bound VMEM (relevant on v7x's 64 MiB).
    TB = min(block_b, _round_up(B, 128))
    num_tiles = pl.cdiv(B, TB)
    B_pad = num_tiles * TB
    if B_pad != B:
        context = jnp.pad(context, ((0, B_pad - B), (0, 0)))

    b1_row = b1.reshape(1, H).astype(jnp.float32)
    w2_row = w2.reshape(1, H).astype(jnp.float32)   # (H,1) -> (1,H) row for the lane reduce
    b2_s = b2.reshape(1).astype(jnp.float32)        # scalar bias, lives in SMEM

    out = pl.pallas_call(
        _stop_predictor_kernel,
        out_shape=jax.ShapeDtypeStruct((1, B_pad), jnp.float32),
        grid_spec=pltpu.PrefetchScalarGridSpec(
            num_scalar_prefetch=0,
            grid=(num_tiles,),
            in_specs=[
                pl.BlockSpec((TB, C), lambda i: (i, 0)),   # x: streamed per tile
                pl.BlockSpec((C, H), lambda i: (0, 0)),    # w1: VMEM-resident
                pl.BlockSpec((1, H), lambda i: (0, 0)),    # b1: VMEM-resident
                pl.BlockSpec((1, H), lambda i: (0, 0)),    # w2 row: VMEM-resident
                pl.BlockSpec(memory_space=pltpu.MemorySpace.SMEM),  # b2 scalar in SMEM
            ],
            out_specs=pl.BlockSpec((1, TB), lambda i: (0, i)),      # lane-dense output row
        ),
        compiler_params=pltpu.CompilerParams(
            dimension_semantics=("parallel",),   # batch tiles split across TCs on v7x
        ),
    )(context, w1, b1_row, w2_row, b2_s)

    return out[0, :B]


def reference(context, w1, b1, w2, b2):
    h = context @ w1 + b1
    h = jnp.where(h > 0, h, 0.01 * h)
    z = h @ w2 + b2
    return jax.nn.sigmoid(z)[:, 0]


if __name__ == "__main__":
    key = jax.random.PRNGKey(0)
    C, H = 32, 64  # context_dim, hidden_dim

    k_ctx, k_w1, k_b1, k_w2, k_b2, k_big = jax.random.split(key, 6)

    # Deterministic init mimicking PyTorch Linear default: U(-1/sqrt(fan_in), 1/sqrt(fan_in))
    lim1 = 1.0 / jnp.sqrt(jnp.float32(C))
    w1 = jax.random.uniform(k_w1, (C, H), jnp.float32, -lim1, lim1)
    b1 = jax.random.uniform(k_b1, (H,), jnp.float32, -lim1, lim1)
    lim2 = 1.0 / jnp.sqrt(jnp.float32(H))
    w2 = jax.random.uniform(k_w2, (H, 1), jnp.float32, -lim2, lim2)
    b2 = jax.random.uniform(k_b2, (1,), jnp.float32, -lim2, lim2)

    # Small-batch case (module-sized): B=8.
    B = 8
    context = jax.random.normal(k_ctx, (B, C), dtype=jnp.float32)
    out = stop_predictor_pallas(context, w1, b1, w2, b2)
    jax.block_until_ready(out)
    ref = reference(context, w1, b1, w2, b2)
    assert out.shape == (B,), out.shape
    # approx reciprocal on the EUP -> slightly looser tolerance than exact fp32 divide
    assert jnp.allclose(out, ref, atol=2e-3, rtol=0), (out, ref)

    # Larger batch exercises the multi-tile ("parallel") grid path and lane-dense stores.
    B_big = 2500
    ctx_big = jax.random.normal(k_big, (B_big, C), dtype=jnp.float32)
    out_big = stop_predictor_pallas(ctx_big, w1, b1, w2, b2)
    jax.block_until_ready(out_big)
    ref_big = reference(ctx_big, w1, b1, w2, b2)
    assert out_big.shape == (B_big,), out_big.shape
    assert jnp.allclose(out_big, ref_big, atol=2e-3, rtol=0)

    # TODO(synk): for single-token decode (B~1) this MLP should be fused into the
    # surrounding decoder-step kernel; a standalone pallas_call is launch-latency bound.
    print("KERNEL_OK")
</pallas_src>

<mosaic_0001>
module attributes {stable_mosaic.version = 11 : i64} {
  func.func @_stop_predictor_kernel(%arg0: i32, %arg1: memref<128x32xf32, #tpu.memory_space<vmem>>, %arg2: memref<32x64xf32, #tpu.memory_space<vmem>>, %arg3: memref<1x64xf32, #tpu.memory_space<vmem>>, %arg4: memref<1x64xf32, #tpu.memory_space<vmem>>, %arg5: memref<1xf32, #tpu.memory_space<smem>>, %arg6: memref<1x128xf32, #tpu.memory_space<vmem>>) attributes {dimension_semantics = [#tpu.dimension_semantics<parallel>], iteration_bounds = array<i64: 1>, scalar_prefetch = 0 : i64, scratch_operands = 0 : i64, tpu.core_type = #tpu.core_type<tc>, window_params = [{transform_indices = @transform_0, window_bounds = array<i64: 128, 32>}, {pipeline_mode = #tpu.pipeline_mode<synchronous>, transform_indices = @transform_1, window_bounds = array<i64: 32, 64>}, {pipeline_mode = #tpu.pipeline_mode<synchronous>, transform_indices = @transform_2, window_bounds = array<i64: 1, 64>}, {pipeline_mode = #tpu.pipeline_mode<synchronous>, transform_indices = @transform_3, window_bounds = array<i64: 1, 64>}, {transform_indices = @transform_4, window_bounds = array<i64: 1>}, {transform_indices = @transform_5, window_bounds = array<i64: 1, 128>}]} {
    %c0 = arith.constant 0 : index
    %c0_0 = arith.constant 0 : index
    %0 = vector.load %arg1[%c0, %c0_0] : memref<128x32xf32, #tpu.memory_space<vmem>>, vector<128x32xf32>
    %c0_1 = arith.constant 0 : index
    %c0_2 = arith.constant 0 : index
    %1 = vector.load %arg2[%c0_1, %c0_2] : memref<32x64xf32, #tpu.memory_space<vmem>>, vector<32x64xf32>
    %cst = arith.constant dense<0.000000e+00> : vector<128x64xf32>
    %2 = tpu.matmul %0, %1, %cst {dimension_numbers = #tpu.dot_dimension_numbers<[1], [0], [0], [1], [0, 0, 1, 1], [], []>} : vector<128x32xf32>, vector<32x64xf32>, vector<128x64xf32> -> vector<128x64xf32>
    %c0_3 = arith.constant 0 : index
    %c0_4 = arith.constant 0 : index
    %3 = vector.load %arg3[%c0_3, %c0_4] : memref<1x64xf32, #tpu.memory_space<vmem>>, vector<1x64xf32>
    %4 = vector.broadcast %3 : vector<1x64xf32> to vector<128x64xf32>
    %5 = arith.addf %2, %4 : vector<128x64xf32>
    %cst_5 = arith.constant 0.000000e+00 : f32
    %6 = vector.broadcast %cst_5 : f32 to vector<128x64xf32>
    %7 = arith.cmpf ogt, %5, %6 : vector<128x64xf32>
    %cst_6 = arith.constant 0.00999999977 : f32
    %8 = vector.broadcast %cst_6 : f32 to vector<128x64xf32>
    %9 = arith.mulf %8, %5 : vector<128x64xf32>
    %10 = arith.select %7, %5, %9 : vector<128x64xi1>, vector<128x64xf32>
    %c0_7 = arith.constant 0 : index
    %c0_8 = arith.constant 0 : index
    %11 = vector.load %arg4[%c0_7, %c0_8] : memref<1x64xf32, #tpu.memory_space<vmem>>, vector<1x64xf32>
    %12 = vector.broadcast %11 : vector<1x64xf32> to vector<128x64xf32>
    %13 = arith.mulf %10, %12 : vector<128x64xf32>
    %cst_9 = arith.constant dense<0.000000e+00> : vector<128xf32>
    %14 = vector.multi_reduction <add>, %13, %cst_9 [1] : vector<128x64xf32> to vector<128xf32>
    %c0_10 = arith.constant 0 : index
    %15 = memref.load %arg5[%c0_10] : memref<1xf32, #tpu.memory_space<smem>>
    %16 = vector.broadcast %15 : f32 to vector<128xf32>
    %17 = arith.addf %14, %16 : vector<128xf32>
    %cst_11 = arith.constant 0.000000e+00 : f32
    %18 = vector.broadcast %cst_11 : f32 to vector<128xf32>
    %19 = arith.subf %18, %17 : vector<128xf32>
    %20 = math.exp %19 : vector<128xf32>
    %cst_12 = arith.constant 1.000000e+00 : f32
    %21 = vector.broadcast %cst_12 : f32 to vector<128xf32>
    %22 = arith.addf %21, %20 : vector<128xf32>
    %23 = tpu.reciprocal %22 {approx = true} : vector<128xf32> -> vector<128xf32>
    %24 = vector.shape_cast %23 : vector<128xf32> to vector<1x128xf32>
    %c0_13 = arith.constant 0 : index
    %c0_14 = arith.constant 0 : index
    %25 = vector.load %arg6[%c0_13, %c0_14] : memref<1x128xf32, #tpu.memory_space<vmem>>, vector<1x128xf32>
    tpu.vector_store %arg6[%c0_13, %c0_14], %24 {strides = array<i32>} : memref<1x128xf32, #tpu.memory_space<vmem>>, vector<1x128xf32>,
    return
  }
  func.func @transform_0(%arg0: i32) -> (i32, i32) {
    %c0_i32 = arith.constant 0 : i32
    %c0_i32_0 = arith.constant 0 : i32
    return %arg0, %c0_i32 : i32, i32
  }
  func.func @transform_1(%arg0: i32) -> (i32, i32) {
    %c0_i32 = arith.constant 0 : i32
    %c0_i32_0 = arith.constant 0 : i32
    %c0_i32_1 = arith.constant 0 : i32
    return %c0_i32, %c0_i32_0 : i32, i32
  }
  func.func @transform_2(%arg0: i32) -> (i32, i32) {
    %c0_i32 = arith.constant 0 : i32
    %c0_i32_0 = arith.constant 0 : i32
    %c0_i32_1 = arith.constant 0 : i32
    return %c0_i32, %c0_i32_0 : i32, i32
  }
  func.func @transform_3(%arg0: i32) -> (i32, i32) {
    %c0_i32 = arith.constant 0 : i32
    %c0_i32_0 = arith.constant 0 : i32
    %c0_i32_1 = arith.constant 0 : i32
    return %c0_i32, %c0_i32_0 : i32, i32
  }
  func.func @transform_4(%arg0: i32) -> i32 {
    %c0_i32 = arith.constant 0 : i32
    %c0_i32_0 = arith.constant 0 : i32
    return %c0_i32 : i32
  }
  func.func @transform_5(%arg0: i32) -> (i32, i32) {
    %c0_i32 = arith.constant 0 : i32
    %c0_i32_0 = arith.constant 0 : i32
    return %c0_i32, %arg0 : i32, i32
  }
}

</mosaic_0001>

<bundles_post_ra>
// kernel: stop_predictor_pallas.1
= control target key start
LH: loop header
LB: loop body
LE: loop exit
PB: predicated region body
PF: predicated region fallthrough
CT: control target
= control target key end

     0   :  { %vm45_vm0 = vcmask 261120   ;;  %vm227_vm3 = vcmask 523264   ;;  %s766_s1 = inlined_call_operand.vmem [shape: f32[32,64], index: 1, kind: input, shape index: {}]   ;;  %s767_s0 = inlined_call_operand.vmem [shape: f32[128,32], index: 0, kind: input, shape index: {}]   ;;  %s768_s2 = inlined_call_operand.vmem [shape: f32[1,64], index: 2, kind: input, shape index: {}]   ;;  %s769_s3 = inlined_call_operand.vmem [shape: f32[1,64], index: 3, kind: input, shape index: {}]   ;;  %s770_s4 = inlined_call_operand.<no memory space> [shape: f32[1], index: 4, kind: input, shape index: {}]   ;;  %s771_s5 = inlined_call_operand.vmem [shape: f32[1,128], index: 5, kind: output, shape index: {}]  }
   0x1   :  { %v40_v0 = vld [vmem:[%s766_s1 + $0x18] sm:$0xff]  ;;  %v39_v1 = vld [vmem:[%s766_s1 + $0x10] sm:$0xff]  ;;  %v38_v2 = vld [vmem:[%s766_s1 + $0x8] sm:$0xff] }
   0x2   :  { %106 = vmatpush.msra.mxu0 %v40_v0  ;;  %475 = vmatpush.msra.mxu1 %v40_v0  ;;  %v37_v3 = vld [vmem:[%s766_s1] sm:$0xff]  ;;  %v22_v8 = vld [vmem:[%s767_s0 + $0x8] sm:$0xff]  ;;  %v23_v12 = vld [vmem:[%s767_s0 + $0x10] sm:$0xff] }
   0x3   :  { %476 = vmatpush.msra.mxu2 %v40_v0  ;;  %477 = vmatpush.msra.mxu3 %v40_v0  ;;  %v21_v4 = vld [vmem:[%s767_s0] sm:$0xff]  ;;  %v30_v9 = vld [vmem:[%s767_s0 + $0x48] sm:$0xff]  ;;  %v31_v13 = vld [vmem:[%s767_s0 + $0x50] sm:$0xff] }
   0x4   :  { %107 = vmatpush.msra.mxu0 %v39_v1  ;;  %478 = vmatpush.msra.mxu1 %v39_v1  ;;  %v25_v5 = vld [vmem:[%s767_s0 + $0x20] sm:$0xff]  ;;  %v26_v10 = vld [vmem:[%s767_s0 + $0x28] sm:$0xff]  ;;  %v27_v14 = vld [vmem:[%s767_s0 + $0x30] sm:$0xff] }
   0x5   :  { %479 = vmatpush.msra.mxu2 %v39_v1  ;;  %480 = vmatpush.msra.mxu3 %v39_v1  ;;  %v29_v6 = vld [vmem:[%s767_s0 + $0x40] sm:$0xff]  ;;  %v34_v11 = vld [vmem:[%s767_s0 + $0x68] sm:$0xff]  ;;  %v35_v15 = vld [vmem:[%s767_s0 + $0x70] sm:$0xff] }
   0x6   :  { %108 = vmatpush.msra.mxu0 %v38_v2  ;;  %481 = vmatpush.msra.mxu1 %v38_v2  ;;  %v33_v7 = vld [vmem:[%s767_s0 + $0x60] sm:$0xff]  ;;  %v24_v16 = vld [vmem:[%s767_s0 + $0x18] sm:$0xff] }
   0x7   :  { %482 = vmatpush.msra.mxu2 %v38_v2  ;;  %483 = vmatpush.msra.mxu3 %v38_v2  ;;  %v32_v17 = vld [vmem:[%s767_s0 + $0x58] sm:$0xff]  ;;  %v662_v20 = vld [vmem:[%s768_s2] ss:$0 sm:$0xff] }
   0x8   :  { %109 = vmatpush.msra.mxu0 %v37_v3  ;;  %484 = vmatpush.msra.mxu1 %v37_v3  ;;  %v28_v18 = vld [vmem:[%s767_s0 + $0x38] sm:$0xff]  ;;  %v669_v25 = vld [vmem:[%s769_s3] ss:$0 sm:$0xff] }
   0x9   :  { %485 = vmatpush.msra.mxu2 %v37_v3  ;;  %459 = vmatmul.msk.f32.vlgmr.msra.gmra.mxu0 %vm45_vm0, %v21_v4  ;;  %v36_v19 = vld [vmem:[%s767_s0 + $0x78] sm:$0xff] }
   0xa   :  { %463 = vmatmul.msk.f32.vlgmr.msra.gmra.mxu1 %vm45_vm0, %v25_v5  ;;  %467 = vmatmul.msk.f32.vlgmr.msra.gmra.mxu2 %vm45_vm0, %v29_v6 }
   0xb   :  { %486 = vmatpush.msra.mxu3 %v37_v3 }
   0xc   :  { %471 = vmatmul.msk.f32.vlgmr.msra.gmra.mxu3 %vm45_vm0, %v33_v7 }
  0x11   :  { %460 = vmatmul.msk.f32.gmra.mxu0 %vm45_vm0, %v22_v8 }
  0x12   :  { %468 = vmatmul.msk.f32.gmra.mxu2 %vm45_vm0, %v30_v9  ;;  %464 = vmatmul.msk.f32.gmra.mxu1 %vm45_vm0, %v26_v10 }
  0x14   :  { %472 = vmatmul.msk.f32.gmra.mxu3 %vm45_vm0, %v34_v11 }
  0x19   :  { %461 = vmatmul.msk.f32.gmra.mxu0 %vm45_vm0, %v23_v12 }
  0x1a   :  { %469 = vmatmul.msk.f32.gmra.mxu2 %vm45_vm0, %v31_v13  ;;  %465 = vmatmul.msk.f32.gmra.mxu1 %vm45_vm0, %v27_v14 }
  0x1c   :  { %473 = vmatmul.msk.f32.gmra.mxu3 %vm45_vm0, %v35_v15 }
  0x21   :  { %462 = vmatmul.msk.f32.gmra.mxu0 %vm45_vm0, %v24_v16 }
  0x22   :  { %470 = vmatmul.msk.f32.gmra.mxu2 %vm45_vm0, %v32_v17  ;;  %466 = vmatmul.msk.f32.gmra.mxu1 %vm45_vm0, %v28_v18 }
  0x24   :  { %474 = vmatmul.msk.f32.gmra.mxu3 %vm45_vm0, %v36_v19 }
  0x86   :  { %v111_v21 = vpop.f32.mrf.mxu0 }
  0x87   :  { %v112_v22 = vadd.f32 %v662_v20, %v111_v21  ;;  %v123_v23 = vpop.f32.mrf.mxu1 }
  0x88   :  { %v124_v24 = vadd.f32 %v662_v20, %v123_v23 }
  0x89   :  { %v175_v26 = vmul.f32 0.01, %v112_v22  ;;  %vm159_vm1 = vcmp.gt.f32.partialorder %v112_v22, 0.0 }
  0x8a   :  { %v179_v27 = vmul.f32 0.01, %v124_v24  ;;  %vm163_vm2 = vcmp.gt.f32.partialorder %v124_v24, 0.0 }
  0x8b   :  { %v191_v28 = vsel %vm159_vm1, %v112_v22, %v175_v26 }
  0x8c   :  { %v195_v29 = vsel %vm163_vm2, %v124_v24, %v179_v27  ;;  %v211_v30 = vmul.f32 %v669_v25, %v191_v28  ;;  %vm395_vm2 = vcmask 130112  }
  0x8d   :  { %v135_v31 = vpop.f32.mrf.mxu2  ;;  %v215_v32 = vmul.f32 %v669_v25, %v195_v29 }
  0x8e   :  { %v136_v33 = vadd.f32 %v662_v20, %v135_v31  ;;  %v114_v34 = vpop.f32.mrf.mxu0  ;;  %v228_v35 = vsel %vm227_vm3, %v211_v30, 0.0 }
  0x8f   :  { %v115_v36 = vadd.f32 %v662_v20, %v114_v34  ;;  %v240_v37 = vsel %vm227_vm3, %v215_v32, 0.0  ;;  %229 = vadd.xlane.f32.xlu0 %v228_v35  ;;  %v126_v38 = vpop.f32.mrf.mxu1  ;;  %v147_v39 = vpop.f32.mrf.mxu3 }
  0x90   :  { %vm167_vm4 = vcmp.gt.f32.partialorder %v136_v33, 0.0  ;;  %v183_v40 = vmul.f32 0.01, %v136_v33  ;;  %241 = vadd.xlane.f32.xlu2 %v240_v37  ;;  %v127_v41 = vadd.f32 %v662_v20, %v126_v38  ;;  %v148_v6 = vadd.f32 %v662_v20, %v147_v39 }
  0x91   :  { %vm160_vm5 = vcmp.gt.f32.partialorder %v115_v36, 0.0  ;;  %v176_v42 = vmul.f32 0.01, %v115_v36 }
  0x92   :  { %v180_v43 = vmul.f32 0.01, %v127_v41  ;;  %v199_v44 = vsel %vm167_vm4, %v136_v33, %v183_v40  ;;  %vm164_vm6 = vcmp.gt.f32.partialorder %v127_v41, 0.0  ;;  %v187_v14 = vmul.f32 0.01, %v148_v6 }
  0x93   :  { %v219_v45 = vmul.f32 %v669_v25, %v199_v44  ;;  %v192_v46 = vsel %vm160_vm5, %v115_v36, %v176_v42  ;;  %vm171_vm11 = vcmp.gt.f32.partialorder %v148_v6, 0.0  ;;  %vm403_vm4 = vcmask 261312  }
  0x94   :  { %v212_v47 = vmul.f32 %v669_v25, %v192_v46  ;;  %v196_v52 = vsel %vm164_vm6, %v127_v41, %v180_v43  ;;  %v203_v26 = vsel %vm171_vm11, %v148_v6, %v187_v14  ;;  %vm407_vm5 = vcmask 326912  }
  0x95   :  { %v138_v48 = vpop.f32.mrf.mxu2  ;;  %v252_v54 = vsel %vm227_vm3, %v219_v45, 0.0  ;;  %v216_v60 = vmul.f32 %v669_v25, %v196_v52  ;;  %v223_v33 = vmul.f32 %v669_v25, %v203_v26  ;;  %vm411_vm6 = vcmask 392512  }
  0x96   :  { %v139_v49 = vadd.f32 %v662_v20, %v138_v48  ;;  %v117_v50 = vpop.f32.mrf.mxu0  ;;  %v231_v51 = vsel %vm227_vm3, %v212_v47, 0.0  ;;  %vm431_vm11 = vcmask 720512  }
  0x97   :  { %v118_v53 = vadd.f32 %v662_v20, %v117_v50  ;;  %232 = vadd.xlane.f32.xlu0 %v231_v51  ;;  %v129_v55 = vpop.f32.mrf.mxu1  ;;  %v684_v56 = vpop.f32.mrf.mxu3  ;;  %v243_v3 = vsel %vm227_vm3, %v216_v60, 0.0  ;;  %v264_v43 = vsel %vm227_vm3, %v223_v33, 0.0 }
  0x98   :  { %vm168_vm7 = vcmp.gt.f32.partialorder %v139_v49, 0.0  ;;  %v184_v57 = vmul.f32 0.01, %v139_v49  ;;  %253 = vadd.xlane.f32.xlu2 %v252_v54  ;;  %v130_v58 = vadd.f32 %v662_v20, %v129_v55  ;;  %v151_v44 = vadd.f32 %v662_v20, %v684_v56 }
  0x99   :  { %v177_v59 = vmul.f32 0.01, %v118_v53  ;;  %vm161_vm8 = vcmp.gt.f32.partialorder %v118_v53, 0.0 }
  0x9a   :  { %vm165_vm9 = vcmp.gt.f32.partialorder %v130_v58, 0.0  ;;  %v181_v61 = vmul.f32 0.01, %v130_v58  ;;  %v200_v62 = vsel %vm168_vm7, %v139_v49, %v184_v57  ;;  %v188_v49 = vmul.f32 0.01, %v151_v44 }
  0x9b   :  { %v193_v63 = vsel %vm161_vm8, %v118_v53, %v177_v59  ;;  %v220_v0 = vmul.f32 %v669_v25, %v200_v62  ;;  %vm172_vm1 = vcmp.gt.f32.partialorder %v151_v44, 0.0  ;;  %v723_v57 = vstv %s770_s4 }
  0x9c   :  { %v213_v1 = vmul.f32 %v669_v25, %v193_v63  ;;  %v197_v4 = vsel %vm165_vm9, %v130_v58, %v181_v61  ;;  %vm415_vm7 = vcmask 458112   ;;  %vm419_vm8 = vcmask 523712  }
  0x9d   :  { %v141_v2 = vpop.f32.mrf.mxu2  ;;  %v255_v8 = vsel %vm227_vm3, %v220_v0, 0.0  ;;  %v217_v13 = vmul.f32 %v669_v25, %v197_v4  ;;  %vm423_vm9 = vcmask 589312  }
  0x9e   :  { %v142_v5 = vadd.f32 %v662_v20, %v141_v2  ;;  %v234_v7 = vsel %vm227_vm3, %v213_v1, 0.0  ;;  %v120_v9 = vpop.f32.mrf.mxu0 }
  0x9f   :  { %235 = vadd.xlane.f32.xlu1 %v234_v7  ;;  %256 = vadd.xlane.f32.xlu0 %v255_v8  ;;  %v121_v10 = vadd.f32 %v662_v20, %v120_v9  ;;  %v153_v11 = vpop.f32.mrf.mxu3  ;;  %v246_v18 = vsel %vm227_vm3, %v217_v13, 0.0  ;;  %v132_v19 = vpop.f32.mrf.mxu1 }
  0xa0   :  { %vm169_vm10 = vcmp.gt.f32.partialorder %v142_v5, 0.0  ;;  %v185_v12 = vmul.f32 0.01, %v142_v5  ;;  %244 = vadd.xlane.f32.xlu2 %v243_v3  ;;  %v154_v21 = vadd.f32 %v662_v20, %v153_v11  ;;  %v133_v27 = vadd.f32 %v662_v20, %v132_v19 }
  0xa1   :  { %v178_v16 = vmul.f32 0.01, %v121_v10  ;;  %vm162_vm12 = vcmp.gt.f32.partialorder %v121_v10, 0.0 }
  0xa2   :  { %v201_v15 = vsel %vm169_vm10, %v142_v5, %v185_v12  ;;  %v189_v31 = vmul.f32 0.01, %v154_v21  ;;  %vm173_vm14 = vcmp.gt.f32.partialorder %v154_v21, 0.0  ;;  %v182_v37 = vmul.f32 0.01, %v133_v27 }
  0xa3   :  { %v221_v17 = vmul.f32 %v669_v25, %v201_v15  ;;  %v194_v28 = vsel %vm162_vm12, %v121_v10, %v178_v16  ;;  %vm166_vm0 = vcmp.gt.f32.partialorder %v133_v27, 0.0  ;;  %vm427_vm10 = vcmask 654912  }
  0xa4   :  { %v214_v35 = vmul.f32 %v669_v25, %v194_v28  ;;  %v205_v39 = vsel %vm173_vm14, %v154_v21, %v189_v31  ;;  %v198_v46 = vsel %vm166_vm0, %v133_v27, %v182_v37  ;;  %vm435_vm12 = vcmask 786112  }
  0xa5   :  { %v144_v22 = vpop.f32.mrf.mxu2  ;;  %v258_v24 = vsel %vm227_vm3, %v221_v17, 0.0  ;;  %v225_v45 = vmul.f32 %v669_v25, %v205_v39  ;;  %v218_v48 = vmul.f32 %v669_v25, %v198_v46  ;;  %vm443_vm14 = vcmask 917312  }
  0xa6   :  { %v145_v23 = vadd.f32 %v662_v20, %v144_v22  ;;  %v237_v42 = vsel %vm227_vm3, %v214_v35, 0.0  ;;  %vm451_vm0 = vcmask 1048512  }
  0xa7   :  { %259 = vadd.xlane.f32.xlu1 %v258_v24  ;;  %247 = vadd.xlane.f32.xlu0 %v246_v18  ;;  %v156_v29 = vpop.f32.mrf.mxu3  ;;  %v270_v50 = vsel %vm227_vm3, %v225_v45, 0.0  ;;  %v249_v52 = vsel %vm227_vm3, %v218_v48, 0.0 }
  0xa8   :  { %vm170_vm13 = vcmp.gt.f32.partialorder %v145_v23, 0.0  ;;  %v186_v30 = vmul.f32 0.01, %v145_v23  ;;  %v157_v32 = vadd.f32 %v662_v20, %v156_v29  ;;  %v204_v20 = vsel %vm172_vm1, %v151_v44, %v188_v49 }
  0xa9   :  { %v224_v53 = vmul.f32 %v669_v25, %v204_v20 }
  0xaa   :  { %v202_v34 = vsel %vm170_vm13, %v145_v23, %v186_v30  ;;  %vm174_vm15 = vcmp.gt.f32.partialorder %v157_v32, 0.0  ;;  %v190_v36 = vmul.f32 0.01, %v157_v32  ;;  %vm439_vm13 = vcmask 851712  }
  0xab   :  { %v222_v38 = vmul.f32 %v669_v25, %v202_v34  ;;  %v267_v54 = vsel %vm227_vm3, %v224_v53, 0.0 }
  0xac   :  { %v206_v41 = vsel %vm174_vm15, %v157_v32, %v190_v36  ;;  %vm447_vm15 = vcmask 982912  }
  0xad   :  { %v261_v40 = vsel %vm227_vm3, %v222_v38, 0.0  ;;  %v226_v47 = vmul.f32 %v669_v25, %v206_v41 }
  0xae   :  { %262 = vadd.xlane.f32.xlu2 %v261_v40 }
  0xaf   :  { %238 = vadd.xlane.f32.xlu1 %v237_v42  ;;  %265 = vadd.xlane.f32.xlu0 %v264_v43  ;;  %v273_v51 = vsel %vm227_vm3, %v226_v47, 0.0  ;;  %vm399_vm3 = vcmask 195712  }
  0xb6   :  { %271 = vadd.xlane.f32.xlu2 %v270_v50  ;;  %v390_v50 = vlaneseq }
  0xb7   :  { %250 = vadd.xlane.f32.xlu1 %v249_v52  ;;  %274 = vadd.xlane.f32.xlu0 %v273_v51 }
  0xbf   :  { %268 = vadd.xlane.f32.xlu1 %v267_v54 }
 0x102   :  { %v230_v55 = vpop.xlane.xlu0 %229 }
 0x103   :  { %v242_v56 = vpop.xlane.xlu2 %241  ;;  %v278_v59 = vadd.f32 %v723_v57, %v230_v55 }
 0x104   :  { %v282_v60 = vadd.f32 %v723_v57, %v242_v56 }
 0x105   :  { %v294_v61 = vsub.f32 0.0, %v278_v59 }
 0x106   :  { %v298_v63 = vsub.f32 0.0, %v282_v60 }
 0x107   :  { %v310_v3 = vmul.f32 1.442695, %v294_v61 }
 0x108   :  { %v318_v4 = vmul.f32 1.442695, %v298_v63 }
 0x109   :  { %489 = vpow2.f32 %v310_v3 }
 0x10a   :  { %v233_v58 = vpop.xlane.xlu0 %232  ;;  %491 = vpow2.f32 %v318_v4 }
 0x10b   :  { %v254_v62 = vpop.xlane.xlu2 %253  ;;  %v279_v25 = vadd.f32 %v723_v57, %v233_v58 }
 0x10c   :  { %v286_v13 = vadd.f32 %v723_v57, %v254_v62  ;;  %v742_v62 = vand.u32 127, %v390_v50 }
 0x10d   :  { %v295_v5 = vsub.f32 0.0, %v279_v25 }
 0x10e   :  { %v302_v21 = vsub.f32 0.0, %v286_v13  ;;  %v393_v4 = vadd.s32 4294967288, %v742_v62 }
 0x10f   :  { %v312_v8 = vmul.f32 1.442695, %v295_v5  ;;  %v490_v14 = vpop.eup %489 }
 0x110   :  { %v492_v15 = vpop.eup %491  ;;  %v342_v19 = vadd.f32 1.0, %v490_v14  ;;  %v326_v36 = vmul.f32 1.442695, %v302_v21  ;;  %v401_v14 = vadd.s32 4294967272, %v742_v62 }
 0x111   :  { %493 = vpow2.f32 %v312_v8  ;;  %v346_v26 = vadd.f32 1.0, %v492_v15 }
 0x112   :  { %v236_v0 = vpop.xlane.xlu1 %235  ;;  %v257_v1 = vpop.xlane.xlu0 %256 }
 0x113   :  { %v280_v2 = vadd.f32 %v723_v57, %v236_v0  ;;  %v245_v7 = vpop.xlane.xlu2 %244  ;;  %v287_v22 = vadd.f32 %v723_v57, %v257_v1 }
 0x114   :  { %v283_v12 = vadd.f32 %v723_v57, %v245_v7  ;;  %v397_v7 = vadd.s32 4294967280, %v742_v62 }
 0x115   :  { %v296_v6 = vsub.f32 0.0, %v280_v2  ;;  %v303_v37 = vsub.f32 0.0, %v287_v22 }
 0x116   :  { %v299_v16 = vsub.f32 0.0, %v283_v12 }
 0x117   :  { %v314_v11 = vmul.f32 1.442695, %v296_v6  ;;  %v494_v29 = vpop.eup %493  ;;  %v328_v46 = vmul.f32 1.442695, %v303_v37  ;;  %v409_v37 = vadd.s32 4294967256, %v742_v62 }
 0x118   :  { %v320_v30 = vmul.f32 1.442695, %v299_v16  ;;  %v343_v38 = vadd.f32 1.0, %v494_v29 }
 0x119   :  { %495 = vpow2.f32 %v314_v11 }
 0x11a   :  { %v260_v9 = vpop.xlane.xlu1 %259  ;;  %v248_v10 = vpop.xlane.xlu0 %247  ;;  %497 = vrcp.f32 %v342_v19 }
 0x11b   :  { %v284_v17 = vadd.f32 %v723_v57, %v248_v10  ;;  %v288_v27 = vadd.f32 %v723_v57, %v260_v9  ;;  %499 = vrcp.f32 %v346_v26 }
 0x11c   :  { %501 = vpow2.f32 %v320_v30 }
 0x11d   :  { %v300_v31 = vsub.f32 0.0, %v284_v17  ;;  %v304_v39 = vsub.f32 0.0, %v288_v27  ;;  %v405_v27 = vadd.s32 4294967264, %v742_v62 }
 0x11f   :  { %v496_v35 = vpop.eup %495  ;;  %v322_v41 = vmul.f32 1.442695, %v300_v31  ;;  %v330_v51 = vmul.f32 1.442695, %v304_v39 }
 0x120   :  { %v344_v43 = vadd.f32 1.0, %v496_v35  ;;  %v498_v20 = vpop.eup %497 }
 0x121   :  { %v263_v18 = vpop.xlane.xlu2 %262  ;;  %v739_v55 = vpop.eup %499 }
 0x122   :  { %v239_v23 = vpop.xlane.xlu1 %238  ;;  %v266_v24 = vpop.xlane.xlu0 %265  ;;  %v289_v32 = vadd.f32 %v723_v57, %v263_v18 }
 0x123   :  { %v281_v28 = vadd.f32 %v723_v57, %v239_v23  ;;  %v290_v34 = vadd.f32 %v723_v57, %v266_v24  ;;  %v502_v60 = vpop.eup %501  ;;  %v392_v23 = vperm.slane %v498_v20, %v742_v62 }
 0x124   :  { %v305_v42 = vsub.f32 0.0, %v289_v32  ;;  %v347_v8 = vadd.f32 1.0, %v502_v60  ;;  %v433_v60 = vadd.s32 4294967208, %v742_v62 }
 0x125   :  { %v297_v33 = vsub.f32 0.0, %v281_v28  ;;  %v306_v44 = vsub.f32 0.0, %v290_v34 }
 0x126   :  { %v332_v53 = vmul.f32 1.442695, %v305_v42  ;;  %v413_v42 = vadd.s32 4294967248, %v742_v62 }
 0x127   :  { %v316_v40 = vmul.f32 1.442695, %v297_v33  ;;  %v334_v56 = vmul.f32 1.442695, %v306_v44 }
 0x129   :  { %503 = vpow2.f32 %v316_v40  ;;  %v272_v45 = vpop.xlane.xlu2 %271  ;;  %v406_v40 = vperm.slane %v739_v55, %v405_v27 }
 0x12a   :  { %505 = vpow2.f32 %v326_v36  ;;  %v292_v47 = vadd.f32 %v723_v57, %v272_v45  ;;  %v251_v48 = vpop.xlane.xlu1 %250  ;;  %v275_v49 = vpop.xlane.xlu0 %274 }
 0x12b   :  { %507 = vrcp.f32 %v343_v38  ;;  %v285_v52 = vadd.f32 %v723_v57, %v251_v48  ;;  %v293_v59 = vadd.f32 %v723_v57, %v275_v49  ;;  %v417_v49 = vadd.s32 4294967240, %v742_v62 }
 0x12c   :  { %509 = vpow2.f32 %v322_v41  ;;  %v308_v54 = vsub.f32 0.0, %v292_v47 }
 0x12d   :  { %511 = vrcp.f32 %v344_v43  ;;  %v301_v58 = vsub.f32 0.0, %v285_v52  ;;  %v309_v25 = vsub.f32 0.0, %v293_v59  ;;  %v425_v52 = vadd.s32 4294967224, %v742_v62 }
 0x12e   :  { %513 = vpow2.f32 %v328_v46  ;;  %v338_v2 = vmul.f32 1.442695, %v308_v54 }
 0x12f   :  { %v504_v61 = vpop.eup %503  ;;  %515 = vpow2.f32 %v330_v51  ;;  %v324_v63 = vmul.f32 1.442695, %v301_v58  ;;  %v340_v5 = vmul.f32 1.442695, %v309_v25  ;;  %v421_v51 = vadd.s32 4294967232, %v742_v62 }
 0x130   :  { %v506_v0 = vpop.eup %505  ;;  %517 = vpow2.f32 %v332_v53  ;;  %v345_v1 = vadd.f32 1.0, %v504_v61 }
 0x131   :  { %v508_v3 = vpop.eup %507  ;;  %519 = vpow2.f32 %v334_v56  ;;  %v350_v13 = vadd.f32 1.0, %v506_v0  ;;  %v429_v56 = vadd.s32 4294967216, %v742_v62 }
 0x132   :  { %v510_v6 = vpop.eup %509  ;;  %521 = vrcp.f32 %v345_v1  ;;  %v269_v9 = vpop.xlane.xlu1 %268  ;;  %v394_v16 = vperm.slane %v508_v3, %v393_v4 }
 0x133   :  { %v512_v10 = vpop.eup %511  ;;  %523 = vpow2.f32 %v324_v63  ;;  %v291_v11 = vadd.f32 %v723_v57, %v269_v9  ;;  %v348_v17 = vadd.f32 1.0, %v510_v6 }
 0x134   :  { %v514_v12 = vpop.eup %513  ;;  %525 = vpow2.f32 %v338_v2  ;;  %v398_v21 = vperm.slane %v512_v10, %v397_v7  ;;  %v396_v29 = vsel %vm395_vm2, %v394_v16, %v392_v23  ;;  %v437_v2 = vadd.s32 4294967200, %v742_v62 }
 0x135   :  { %v516_v15 = vpop.eup %515  ;;  %v307_v18 = vsub.f32 0.0, %v291_v11  ;;  %527 = vpow2.f32 %v340_v5  ;;  %v351_v24 = vadd.f32 1.0, %v514_v12  ;;  %v441_v7 = vadd.s32 4294967192, %v742_v62 }
 0x136   :  { %v518_v19 = vpop.eup %517  ;;  %529 = vrcp.f32 %v347_v8  ;;  %v352_v30 = vadd.f32 1.0, %v516_v15  ;;  %v400_v33 = vsel %vm399_vm3, %v398_v21, %v396_v29  ;;  %v445_v10 = vadd.s32 4294967184, %v742_v62 }
 0x137   :  { %v520_v22 = vpop.eup %519  ;;  %v336_v57 = vmul.f32 1.442695, %v307_v18  ;;  %531 = vrcp.f32 %v350_v13  ;;  %v353_v34 = vadd.f32 1.0, %v518_v19 }
 0x138   :  { %v522_v26 = vpop.eup %521  ;;  %533 = vrcp.f32 %v348_v17  ;;  %v354_v41 = vadd.f32 1.0, %v520_v22 }
 0x139   :  { %v524_v28 = vpop.eup %523  ;;  %v402_v31 = vperm.slane %v522_v26, %v401_v14  ;;  %535 = vpow2.f32 %v336_v57  ;;  %v449_v14 = vadd.s32 4294967176, %v742_v62 }
 0x13a   :  { %v526_v32 = vpop.eup %525  ;;  %v349_v35 = vadd.f32 1.0, %v524_v28  ;;  %537 = vrcp.f32 %v351_v24 }
 0x13b   :  { %v528_v36 = vpop.eup %527  ;;  %v404_v38 = vsel %vm403_vm4, %v402_v31, %v400_v33  ;;  %v356_v43 = vadd.f32 1.0, %v526_v32 }
 0x13c   :  { %v530_v39 = vpop.eup %529  ;;  %539 = vrcp.f32 %v349_v35  ;;  %v408_v45 = vsel %vm407_vm5, %v406_v40, %v404_v38  ;;  %v357_v46 = vadd.f32 1.0, %v528_v36 }
 0x13d   :  { %541 = vrcp.f32 %v352_v30  ;;  %v532_v44 = vpop.eup %531  ;;  %v410_v48 = vperm.slane %v530_v39, %v409_v37 }
 0x13e   :  { %543 = vrcp.f32 %v353_v34  ;;  %v534_v47 = vpop.eup %533  ;;  %v422_v25 = vperm.slane %v532_v44, %v421_v51 }
 0x13f   :  { %v536_v50 = vpop.eup %535  ;;  %545 = vrcp.f32 %v354_v41  ;;  %v412_v53 = vsel %vm411_vm6, %v410_v48, %v408_v45  ;;  %v414_v58 = vperm.slane %v534_v47, %v413_v42 }
 0x140   :  { %v538_v20 = vpop.eup %537  ;;  %547 = vrcp.f32 %v356_v43  ;;  %v355_v54 = vadd.f32 1.0, %v536_v50 }
 0x141   :  { %549 = vrcp.f32 %v357_v46  ;;  %v416_v0 = vsel %vm415_vm7, %v414_v58, %v412_v53  ;;  %v426_v1 = vperm.slane %v538_v20, %v425_v52 }
 0x142   :  { %v540_v55 = vpop.eup %539  ;;  %551 = vrcp.f32 %v355_v54 }
 0x143   :  { %v542_v59 = vpop.eup %541  ;;  %v418_v61 = vperm.slane %v540_v55, %v417_v49 }
 0x144   :  { %v544_v63 = vpop.eup %543  ;;  %v430_v5 = vperm.slane %v542_v59, %v429_v56 }
 0x145   :  { %v420_v3 = vsel %vm419_vm8, %v418_v61, %v416_v0  ;;  %v546_v4 = vpop.eup %545  ;;  %v434_v9 = vperm.slane %v544_v63, %v433_v60 }
 0x146   :  { %v424_v6 = vsel %vm423_vm9, %v422_v25, %v420_v3  ;;  %v548_v8 = vpop.eup %547  ;;  %v438_v16 = vperm.slane %v546_v4, %v437_v2 }
 0x147   :  { %v428_v11 = vsel %vm427_vm10, %v426_v1, %v424_v6  ;;  %v550_v12 = vpop.eup %549  ;;  %v446_v19 = vperm.slane %v548_v8, %v445_v10 }
 0x148   :  { %v432_v13 = vsel %vm431_vm11, %v430_v5, %v428_v11  ;;  %v552_v15 = vpop.eup %551  ;;  %v450_v23 = vperm.slane %v550_v12, %v449_v14 }
 0x149   :  { %v436_v17 = vsel %vm435_vm12, %v434_v9, %v432_v13  ;;  %v442_v18 = vperm.slane %v552_v15, %v441_v7 }
 0x14a   :  { %v440_v21 = vsel %vm439_vm13, %v438_v16, %v436_v17 }
 0x14b   :  { %v444_v22 = vsel %vm443_vm14, %v442_v18, %v440_v21 }
 0x14c   :  { %v448_v24 = vsel %vm447_vm15, %v446_v19, %v444_v22 }
 0x14d   :  { %v452_v57 = vsel %vm451_vm0, %v450_v23, %v448_v24 }
 0x14e   :  { %454 = vst [vmem:[%s771_s5] sm:$0x1] %v452_v57 }

</bundles_post_ra>
